<compile_context>
chip_gen: v5e
topology: v5e:2x2
jax: 0.10.0
libtpu: 0.0.40
codegen_flags: <defaults>
</compile_context>

<pallas_src>
import functools

import jax
import jax.numpy as jnp
from jax.experimental import pallas as pl
from jax.experimental.pallas import tpu as pltpu


def _compress_ch(in_channels, reduction):
    compression = in_channels // reduction
    if compression < 2:
        compression = 2
    return compression


def _cdiv(a, b):
    return -(-a // b)


def _round_up(v, m):
    return _cdiv(v, m) * m


def _vmem_capacity_bytes():
    try:
        info = pltpu.get_tpu_info()
        cap = getattr(info, "vmem_capacity_bytes", None)
        if cap:
            return int(cap)
    except Exception:
        pass
    return 64 * 1024 * 1024  # conservative default (v7x physical VMEM)


def _pick_spatial_tile(S, C, itemsize, cap, per_buffer_bytes=None):
    """Largest lane-aligned spatial tile whose phase-3 footprint
    (2 in + 2 out native double-buffers + ~2 f32 temporaries) fits the budget."""
    if S <= 128:
        return S
    budget = min(int(cap * 0.45), 48 << 20)
    denom = C * (4 * itemsize + 8)
    ts = (budget // denom) // 128 * 128
    if per_buffer_bytes is not None:
        ts = min(ts, (per_buffer_bytes // (C * itemsize)) // 128 * 128)
    ts = max(128, ts)
    return min(ts, S)


# ---------------------------------------------------------------------------
# Fused single-read kernel: squeeze + excite + apply for one batch item.
# ---------------------------------------------------------------------------
def _scse_fused_kernel(x_ref, w1t_ref, b1_ref, w2_ref, b2_ref, ws_ref, bs_ref,
                       o_ref, *, chunks, inv_s):
    C = x_ref.shape[0]

    # --- squeeze: spatial mean with f32 accumulation, chunked over lanes ---
    acc = jnp.zeros((C, 1), jnp.float32)
    for st, w in chunks:
        acc = acc + jnp.sum(x_ref[:, st:st + w].astype(jnp.float32),
                            axis=1, keepdims=True)
    mean = acc * inv_s                                                      # (C, 1)

    # --- excite: two tiny 1x1x1-conv layers done on the VPU (no MXU needed) ---
    h = jnp.maximum(jnp.sum(mean * w1t_ref[...], axis=0, keepdims=True)
                    + b1_ref[...], 0.0)                                     # (1, comp)
    gate_c = jax.nn.sigmoid(jnp.sum(w2_ref[...] * h, axis=1, keepdims=True)
                            + b2_ref[...])                                  # (C, 1)
    wsg = ws_ref[...] * gate_c                                              # (C, 1)
    bs = bs_ref[0]

    # --- apply: out = max(x*gate_c, x*sigmoid(sum_c wsg[c]*x[c,:] + bs)) ---
    for st, w in chunks:
        xc = x_ref[:, st:st + w]                                            # native dtype
        s_lin = jnp.sum(wsg * xc.astype(jnp.float32), axis=0,
                        keepdims=True) + bs                                 # (1, w) f32
        gate_s = jax.nn.sigmoid(s_lin)
        o_ref[:, st:st + w] = jnp.maximum(
            xc * gate_c.astype(xc.dtype),
            xc * gate_s.astype(xc.dtype)).astype(o_ref.dtype)


# ---------------------------------------------------------------------------
# Tiled phase 1: lane-dense (C, 128) f32 partial sums over spatial tiles.
# ---------------------------------------------------------------------------
def _spatial_sum_kernel(x_ref, sum_ref, *, S, ts, tpp, needs_mask):
    p_idx = pl.program_id(1)
    t_idx = pl.program_id(2)

    @pl.when(t_idx == 0)
    def _():
        sum_ref[...] = jnp.zeros_like(sum_ref)

    C = x_ref.shape[0]
    base = (p_idx * tpp + t_idx) * ts          # logical element offset of this tile

    if ts % 128 == 0:
        # VPU-only accumulation over 128-wide ref slices (lane-dense, no XLU reduce).
        def body(j, acc):
            off = pl.multiple_of(j * 128, 128)
            blk = x_ref[:, pl.ds(off, 128)].astype(jnp.float32)             # (C, 128)
            if needs_mask:
                lane = jax.lax.broadcasted_iota(jnp.int32, (C, 128), 1)
                blk = jnp.where(base + off + lane < S, blk, 0.0)
            return acc + blk

        part = jax.lax.fori_loop(0, ts // 128, body,
                                 jnp.zeros((C, 128), jnp.float32))
        sum_ref[...] += part
    else:
        # Only reachable when S < 128 (single, full-extent tile).
        xt = x_ref[...].astype(jnp.float32)                                 # (C, ts)
        if needs_mask:
            lane = jax.lax.broadcasted_iota(jnp.int32, xt.shape, 1)
            xt = jnp.where(base + lane < S, xt, 0.0)
        col = jax.lax.broadcasted_iota(jnp.int32, (C, 128), 1)
        part = jnp.where(col == 0, jnp.sum(xt, axis=1, keepdims=True), 0.0)
        sum_ref[...] += part


# ---------------------------------------------------------------------------
# Tiled phase 3: elementwise apply + sSE sublane reduce per spatial tile.
# ---------------------------------------------------------------------------
def _scse_apply_kernel(gate_ref, bs_ref, x_ref, o_ref):
    x = x_ref[...]                               # (C, ts) native dtype
    g = gate_ref[...]                            # (C, 2)  f32: [gate_c, ws*gate_c]
    gate_c = g[:, 0:1]
    wsg = g[:, 1:2]
    # sSE input (matches the PyTorch forward): sum_c ws[c]*(gate_c[c]*x[c,:]) + bs,
    # accumulated in f32.
    s_lin = jnp.sum(wsg * x.astype(jnp.float32), axis=0, keepdims=True) + bs_ref[0]
    gate_s = jax.nn.sigmoid(s_lin)               # (1, ts) f32
    # Elementwise gating in the input dtype (bf16 stays bf16 on v6e/v7x).
    o_ref[...] = jnp.maximum(x * gate_c.astype(x.dtype),
                             x * gate_s.astype(x.dtype)).astype(o_ref.dtype)


# ---------------------------------------------------------------------------
# Wrapper / dispatcher.
# ---------------------------------------------------------------------------
def scse3d_pallas(x, params, *, force_tiled=False, per_buffer_bytes=None):
    """x: (N, C, D, H, W). params: (w1t, b1, w2, b2, ws, bs) as produced by make_params."""
    w1t, b1, w2, b2, ws, bs = params
    N, C, D, H, W = x.shape
    S = D * H * W
    comp = w1t.shape[1]
    itemsize = jnp.dtype(x.dtype).itemsize
    xf = x.reshape(N, C, S)                      # native dtype end-to-end in HBM
    cap = _vmem_capacity_bytes()

    w1t_f = w1t.astype(jnp.float32)              # (C, comp)
    b1_f = b1.reshape(1, comp).astype(jnp.float32)
    w2_f = w2.astype(jnp.float32)                # (C, comp)
    b2_f = b2.reshape(C, 1).astype(jnp.float32)
    ws_f = ws.reshape(C, 1).astype(jnp.float32)
    bs_smem = bs.reshape((1,)).astype(jnp.float32)

    # ----------------------- fused single-read path -----------------------
    slab = C * S * itemsize
    if S <= 128:
        ch = S
    else:
        ch = max(128, ((2 << 20) // (4 * C)) // 128 * 128)   # ~2 MiB of f32 temps/chunk
        ch = max(ch, _round_up(_cdiv(S, 64), 128))           # bound chunk count
    chunks = tuple((st, min(ch, S - st)) for st in range(0, S, ch))
    eff_ch = min(ch, S)
    fused_foot = 4 * slab + 3 * C * eff_ch * 4 + (2 << 20)

    if (not force_tiled) and fused_foot <= int(cap * 0.65):
        vmem_limit = int(min(max(fused_foot + (4 << 20), 16 << 20), cap * 3 // 4))
        out = pl.pallas_call(
            functools.partial(_scse_fused_kernel, chunks=chunks, inv_s=1.0 / S),
            out_shape=jax.ShapeDtypeStruct((N, C, S), x.dtype),
            grid_spec=pltpu.PrefetchScalarGridSpec(
                num_scalar_prefetch=0,
                grid=(N,),
                in_specs=[
                    pl.BlockSpec((None, C, S), lambda n: (n, 0, 0)),       # x slab
                    pl.BlockSpec((C, comp), lambda n: (0, 0)),             # w1t
                    pl.BlockSpec((1, comp), lambda n: (0, 0)),             # b1
                    pl.BlockSpec((C, comp), lambda n: (0, 0)),             # w2
                    pl.BlockSpec((C, 1), lambda n: (0, 0)),                # b2
                    pl.BlockSpec((C, 1), lambda n: (0, 0)),                # ws
                    pl.BlockSpec(memory_space=pltpu.MemorySpace.SMEM),     # bs scalar
                ],
                out_specs=pl.BlockSpec((None, C, S), lambda n: (n, 0, 0)),
            ),
            compiler_params=pltpu.CompilerParams(
                dimension_semantics=("parallel",),
                vmem_limit_bytes=vmem_limit,
            ),
        )(xf, w1t_f, b1_f, w2_f, b2_f, ws_f, bs_smem)
        return out.reshape(N, C, D, H, W)

    # --------------------------- tiled 2-kernel path ---------------------------
    ts = _pick_spatial_tile(S, C, itemsize, cap, per_buffer_bytes)
    num_tiles = _cdiv(S, ts)
    P = 2 if num_tiles >= 2 else 1               # extra megacore-parallel axis (v7x, N small)
    tpp = _cdiv(num_tiles, P)
    needs_mask = (P * tpp * ts) != S             # ragged last tile and/or duplicated tile

    tile_foot = C * ts * (4 * itemsize + 8) + (2 << 20)
    vmem_limit = int(min(max(tile_foot + (4 << 20), 16 << 20), cap * 3 // 4))

    if P * tpp > num_tiles:
        # Clamp so no block is fetched fully out of bounds; the in-kernel mask
        # (based on the *logical* tile index) zeroes the duplicate contribution.
        x1_map = lambda n, p, t: (n, 0, jnp.minimum(p * tpp + t, num_tiles - 1))
    else:
        x1_map = lambda n, p, t: (n, 0, p * tpp + t)

    # ---- Phase 1: lane-dense partial sums, accumulator resident across tiles ----
    partials = pl.pallas_call(
        functools.partial(_spatial_sum_kernel, S=S, ts=ts, tpp=tpp,
                          needs_mask=needs_mask),
        out_shape=jax.ShapeDtypeStruct((N, P, C, 128), jnp.float32),
        grid_spec=pltpu.PrefetchScalarGridSpec(
            num_scalar_prefetch=0,
            grid=(N, P, tpp),
            in_specs=[pl.BlockSpec((None, C, ts), x1_map)],
            out_specs=pl.BlockSpec((None, None, C, 128),
                                   lambda n, p, t: (n, p, 0, 0)),
        ),
        compiler_params=pltpu.CompilerParams(
            dimension_semantics=("parallel", "parallel", "arbitrary"),
            vmem_limit_bytes=vmem_limit,
        ),
    )(xf)

    # ---- Phase 2: tiny batched squeeze/excite gate in plain jnp (O(N*C)) ----
    sums = jnp.sum(partials, axis=(1, 3))                                   # (N, C) f32
    mean = sums * (1.0 / S)
    h = jnp.maximum(mean @ w1t_f + b1_f, 0.0)                               # (N, comp)
    gate_c = jax.nn.sigmoid(h @ w2_f.T + b2_f.reshape(1, C))                # (N, C)
    gate_pack = jnp.stack([gate_c, gate_c * ws_f.reshape(1, C)], axis=-1)   # (N, C, 2)

    # ---- Phase 3: fully parallel spatially tiled apply pass ----
    out = pl.pallas_call(
        _scse_apply_kernel,
        out_shape=jax.ShapeDtypeStruct((N, C, S), x.dtype),
        grid_spec=pltpu.PrefetchScalarGridSpec(
            num_scalar_prefetch=0,
            grid=(N, num_tiles),
            in_specs=[
                pl.BlockSpec((None, C, 2), lambda n, s: (n, 0, 0)),         # packed gates
                pl.BlockSpec(memory_space=pltpu.MemorySpace.SMEM),          # bs scalar
                pl.BlockSpec((None, C, ts), lambda n, s: (n, 0, s)),        # x tile
            ],
            out_specs=pl.BlockSpec((None, C, ts), lambda n, s: (n, 0, s)),
        ),
        compiler_params=pltpu.CompilerParams(
            dimension_semantics=("parallel", "parallel"),
            vmem_limit_bytes=vmem_limit,
        ),
    )(gate_pack, bs_smem, xf)

    return out.reshape(N, C, D, H, W)


def scse3d_ref(x, params):
    """Pure-JAX reference mirroring the PyTorch forward (for verification)."""
    w1t, b1, w2, b2, ws, bs = params
    mean = x.mean(axis=(2, 3, 4))                                           # (N, C)
    h = jnp.maximum(mean @ w1t + b1.reshape(1, -1), 0.0)                    # (N, comp)
    gate_c = jax.nn.sigmoid(h @ w2.T + b2.reshape(1, -1))                   # (N, C)
    cse = x * gate_c[:, :, None, None, None]
    s = jnp.einsum("ncdhw,c->ndhw", cse, ws.reshape(-1)) + bs.reshape(())
    sse = x * jax.nn.sigmoid(s)[:, None]
    return jnp.maximum(cse, sse)


def make_params(key, in_channels, reduction=16):
    comp = _compress_ch(in_channels, reduction)
    k1, k2, k3, k4, k5, k6 = jax.random.split(key, 6)
    # Conv3d(in_channels, comp, 1): torch weight (comp, C, 1,1,1) -> pass transposed (C, comp)
    w1t = 0.5 * jax.random.normal(k1, (in_channels, comp), jnp.float32)
    b1 = 0.1 * jax.random.normal(k2, (1, comp), jnp.float32)
    # Conv3d(comp, in_channels, 1): torch weight (C, comp, 1,1,1) -> (C, comp)
    w2 = 0.5 * jax.random.normal(k3, (in_channels, comp), jnp.float32)
    b2 = 0.1 * jax.random.normal(k4, (in_channels, 1), jnp.float32)
    # Conv3d(in_channels, 1, 1): torch weight (1, C, 1,1,1) -> (C, 1)
    ws = 0.5 * jax.random.normal(k5, (in_channels, 1), jnp.float32)
    bs = 0.1 * jax.random.normal(k6, (1, 1), jnp.float32)
    return (w1t, b1, w2, b2, ws, bs)


if __name__ == "__main__":
    key = jax.random.PRNGKey(0)
    kx, kp = jax.random.split(key)

    # Test 1: small f32 case -> fused single-read path.
    N, C, D, H, W = 2, 4, 4, 8, 8            # S = 256
    x = jax.random.normal(kx, (N, C, D, H, W), jnp.float32)
    params = make_params(kp, in_channels=C, reduction=16)
    out = jax.block_until_ready(scse3d_pallas(x, params))
    ref = scse3d_ref(x, params)
    assert out.shape == x.shape
    assert jnp.allclose(out, ref, atol=1e-4, rtol=1e-4), "mismatch (fused f32)"

    # Test 2: tiled path, multi-tile with ragged last tile (S=2176, ts=256 -> 9 tiles, P=2).
    N2, C2, D2, H2, W2 = 1, 8, 8, 16, 17
    x2 = jax.random.normal(kx, (N2, C2, D2, H2, W2), jnp.float32)
    params2 = make_params(kp, in_channels=C2, reduction=16)
    out2 = jax.block_until_ready(
        scse3d_pallas(x2, params2, force_tiled=True, per_buffer_bytes=8 * 1024))
    ref2 = scse3d_ref(x2, params2)
    assert jnp.allclose(out2, ref2, atol=1e-4, rtol=1e-4), "mismatch (tiled f32 ragged)"

    # Test 3: bf16 end-to-end I/O through the fused path.
    xb = x.astype(jnp.bfloat16)
    out3 = jax.block_until_ready(scse3d_pallas(xb, params))
    ref3 = scse3d_ref(xb.astype(jnp.float32), params)
    assert out3.dtype == jnp.bfloat16
    assert jnp.allclose(out3.astype(jnp.float32), ref3, atol=5e-2, rtol=5e-2), \
        "mismatch (bf16 fused)"

    # Test 4: bf16 through the tiled path (ragged + clamped duplicate phase-1 tile).
    x2b = x2.astype(jnp.bfloat16)
    out4 = jax.block_until_ready(
        scse3d_pallas(x2b, params2, force_tiled=True, per_buffer_bytes=8 * 1024))
    ref4 = scse3d_ref(x2b.astype(jnp.float32), params2)
    assert jnp.allclose(out4.astype(jnp.float32), ref4, atol=5e-2, rtol=5e-2), \
        "mismatch (bf16 tiled)"

    # Test 5: tiny spatial extent (S < 128) through the tiled path (single full-extent tile).
    N5, C5, D5, H5, W5 = 1, 4, 2, 4, 8        # S = 64
    x5 = jax.random.normal(kx, (N5, C5, D5, H5, W5), jnp.float32)
    params5 = make_params(kp, in_channels=C5, reduction=16)
    out5 = jax.block_until_ready(scse3d_pallas(x5, params5, force_tiled=True))
    ref5 = scse3d_ref(x5, params5)
    assert jnp.allclose(out5, ref5, atol=1e-4, rtol=1e-4), "mismatch (tiled small-S)"

    print("KERNEL_OK")
</pallas_src>

<mosaic_0001>
module attributes {stable_mosaic.version = 11 : i64} {
  func.func @_scse_fused_kernel(%arg0: i32, %arg1: memref<1x4x256xf32, #tpu.memory_space<vmem>>, %arg2: memref<4x2xf32, #tpu.memory_space<vmem>>, %arg3: memref<1x2xf32, #tpu.memory_space<vmem>>, %arg4: memref<4x2xf32, #tpu.memory_space<vmem>>, %arg5: memref<4x1xf32, #tpu.memory_space<vmem>>, %arg6: memref<4x1xf32, #tpu.memory_space<vmem>>, %arg7: memref<1xf32, #tpu.memory_space<smem>>, %arg8: memref<1x4x256xf32, #tpu.memory_space<vmem>>) attributes {dimension_semantics = [#tpu.dimension_semantics<parallel>], iteration_bounds = array<i64: 2>, scalar_prefetch = 0 : i64, scratch_operands = 0 : i64, tpu.core_type = #tpu.core_type<tc>, window_params = [{transform_indices = @transform_0, window_bounds = array<i64: 1, 4, 256>}, {pipeline_mode = #tpu.pipeline_mode<synchronous>, transform_indices = @transform_1, window_bounds = array<i64: 4, 2>}, {pipeline_mode = #tpu.pipeline_mode<synchronous>, transform_indices = @transform_2, window_bounds = array<i64: 1, 2>}, {pipeline_mode = #tpu.pipeline_mode<synchronous>, transform_indices = @transform_3, window_bounds = array<i64: 4, 2>}, {pipeline_mode = #tpu.pipeline_mode<synchronous>, transform_indices = @transform_4, window_bounds = array<i64: 4, 1>}, {pipeline_mode = #tpu.pipeline_mode<synchronous>, transform_indices = @transform_5, window_bounds = array<i64: 4, 1>}, {transform_indices = @transform_6, window_bounds = array<i64: 1>}, {transform_indices = @transform_7, window_bounds = array<i64: 1, 4, 256>}]} {
    %cst = arith.constant 0.000000e+00 : f32
    %0 = vector.broadcast %cst : f32 to vector<4x1xf32>
    %c0 = arith.constant 0 : index
    %c0_0 = arith.constant 0 : index
    %c0_1 = arith.constant 0 : index
    %1 = vector.load %arg1[%c0, %c0_0, %c0_1] : memref<1x4x256xf32, #tpu.memory_space<vmem>>, vector<1x4x256xf32>
    %2 = vector.shape_cast %1 : vector<1x4x256xf32> to vector<4x256xf32>
    %cst_2 = arith.constant dense<0.000000e+00> : vector<4xf32>
    %3 = vector.multi_reduction <add>, %2, %cst_2 [1] : vector<4x256xf32> to vector<4xf32>
    %4 = vector.shape_cast %3 : vector<4xf32> to vector<4x1xf32>
    %5 = arith.addf %0, %4 : vector<4x1xf32>
    %cst_3 = arith.constant 3.906250e-03 : f32
    %6 = vector.broadcast %cst_3 : f32 to vector<4x1xf32>
    %7 = arith.mulf %5, %6 : vector<4x1xf32>
    %c0_4 = arith.constant 0 : index
    %c0_5 = arith.constant 0 : index
    %8 = vector.load %arg2[%c0_4, %c0_5] : memref<4x2xf32, #tpu.memory_space<vmem>>, vector<4x2xf32>
    %9 = vector.broadcast %7 : vector<4x1xf32> to vector<4x2xf32>
    %10 = arith.mulf %9, %8 : vector<4x2xf32>
    %cst_6 = arith.constant dense<0.000000e+00> : vector<2xf32>
    %11 = vector.multi_reduction <add>, %10, %cst_6 [0] : vector<4x2xf32> to vector<2xf32>
    %12 = vector.shape_cast %11 : vector<2xf32> to vector<1x2xf32>
    %c0_7 = arith.constant 0 : index
    %c0_8 = arith.constant 0 : index
    %13 = vector.load %arg3[%c0_7, %c0_8] : memref<1x2xf32, #tpu.memory_space<vmem>>, vector<1x2xf32>
    %14 = arith.addf %12, %13 : vector<1x2xf32>
    %cst_9 = arith.constant 0.000000e+00 : f32
    %15 = vector.broadcast %cst_9 : f32 to vector<1x2xf32>
    %16 = arith.maximumf %14, %15 : vector<1x2xf32>
    %c0_10 = arith.constant 0 : index
    %c0_11 = arith.constant 0 : index
    %17 = vector.load %arg4[%c0_10, %c0_11] : memref<4x2xf32, #tpu.memory_space<vmem>>, vector<4x2xf32>
    %18 = vector.broadcast %16 : vector<1x2xf32> to vector<4x2xf32>
    %19 = arith.mulf %17, %18 : vector<4x2xf32>
    %cst_12 = arith.constant dense<0.000000e+00> : vector<4xf32>
    %20 = vector.multi_reduction <add>, %19, %cst_12 [1] : vector<4x2xf32> to vector<4xf32>
    %21 = vector.shape_cast %20 : vector<4xf32> to vector<4x1xf32>
    %c0_13 = arith.constant 0 : index
    %c0_14 = arith.constant 0 : index
    %22 = vector.load %arg5[%c0_13, %c0_14] : memref<4x1xf32, #tpu.memory_space<vmem>>, vector<4x1xf32>
    %23 = arith.addf %21, %22 : vector<4x1xf32>
    %24 = arith.negf %23 : vector<4x1xf32>
    %25 = math.exp %24 : vector<4x1xf32>
    %cst_15 = arith.constant 1.000000e+00 : f32
    %26 = vector.broadcast %cst_15 : f32 to vector<4x1xf32>
    %27 = arith.addf %26, %25 : vector<4x1xf32>
    %28 = arith.divf %26, %27 : vector<4x1xf32>
    %c0_16 = arith.constant 0 : index
    %c0_17 = arith.constant 0 : index
    %29 = vector.load %arg6[%c0_16, %c0_17] : memref<4x1xf32, #tpu.memory_space<vmem>>, vector<4x1xf32>
    %30 = arith.mulf %29, %28 : vector<4x1xf32>
    %c0_18 = arith.constant 0 : index
    %31 = memref.load %arg7[%c0_18] : memref<1xf32, #tpu.memory_space<smem>>
    %c0_19 = arith.constant 0 : index
    %c0_20 = arith.constant 0 : index
    %c0_21 = arith.constant 0 : index
    %32 = vector.load %arg1[%c0_19, %c0_20, %c0_21] : memref<1x4x256xf32, #tpu.memory_space<vmem>>, vector<1x4x256xf32>
    %33 = vector.shape_cast %32 : vector<1x4x256xf32> to vector<4x256xf32>
    %34 = vector.broadcast %30 : vector<4x1xf32> to vector<4x256xf32>
    %35 = arith.mulf %34, %33 : vector<4x256xf32>
    %cst_22 = arith.constant dense<0.000000e+00> : vector<256xf32>
    %36 = vector.multi_reduction <add>, %35, %cst_22 [0] : vector<4x256xf32> to vector<256xf32>
    %37 = vector.shape_cast %36 : vector<256xf32> to vector<1x256xf32>
    %38 = vector.broadcast %31 : f32 to vector<1x256xf32>
    %39 = arith.addf %37, %38 : vector<1x256xf32>
    %40 = arith.negf %39 : vector<1x256xf32>
    %41 = math.exp %40 : vector<1x256xf32>
    %cst_23 = arith.constant 1.000000e+00 : f32
    %42 = vector.broadcast %cst_23 : f32 to vector<1x256xf32>
    %43 = arith.addf %42, %41 : vector<1x256xf32>
    %44 = arith.divf %42, %43 : vector<1x256xf32>
    %45 = vector.broadcast %28 : vector<4x1xf32> to vector<4x256xf32>
    %46 = arith.mulf %33, %45 : vector<4x256xf32>
    %47 = vector.broadcast %44 : vector<1x256xf32> to vector<4x256xf32>
    %48 = arith.mulf %33, %47 : vector<4x256xf32>
    %49 = arith.maximumf %46, %48 : vector<4x256xf32>
    %c0_24 = arith.constant 0 : index
    %c0_25 = arith.constant 0 : index
    %c0_26 = arith.constant 0 : index
    %50 = vector.load %arg8[%c0_24, %c0_25, %c0_26] : memref<1x4x256xf32, #tpu.memory_space<vmem>>, vector<1x4x256xf32>
    %51 = vector.shape_cast %50 : vector<1x4x256xf32> to vector<4x256xf32>
    %52 = vector.shape_cast %49 : vector<4x256xf32> to vector<1x4x256xf32>
    tpu.vector_store %arg8[%c0_24, %c0_25, %c0_26], %52 {strides = array<i32>} : memref<1x4x256xf32, #tpu.memory_space<vmem>>, vector<1x4x256xf32>,
    return
  }
  func.func @transform_0(%arg0: i32) -> (i32, i32, i32) {
    %c0_i32 = arith.constant 0 : i32
    %c0_i32_0 = arith.constant 0 : i32
    %c0_i32_1 = arith.constant 0 : i32
    return %arg0, %c0_i32, %c0_i32_0 : i32, i32, i32
  }
  func.func @transform_1(%arg0: i32) -> (i32, i32) {
    %c0_i32 = arith.constant 0 : i32
    %c0_i32_0 = arith.constant 0 : i32
    %c0_i32_1 = arith.constant 0 : i32
    return %c0_i32, %c0_i32_0 : i32, i32
  }
  func.func @transform_2(%arg0: i32) -> (i32, i32) {
    %c0_i32 = arith.constant 0 : i32
    %c0_i32_0 = arith.constant 0 : i32
    %c0_i32_1 = arith.constant 0 : i32
    return %c0_i32, %c0_i32_0 : i32, i32
  }
  func.func @transform_3(%arg0: i32) -> (i32, i32) {
    %c0_i32 = arith.constant 0 : i32
    %c0_i32_0 = arith.constant 0 : i32
    %c0_i32_1 = arith.constant 0 : i32
    return %c0_i32, %c0_i32_0 : i32, i32
  }
  func.func @transform_4(%arg0: i32) -> (i32, i32) {
    %c0_i32 = arith.constant 0 : i32
    %c0_i32_0 = arith.constant 0 : i32
    %c0_i32_1 = arith.constant 0 : i32
    return %c0_i32, %c0_i32_0 : i32, i32
  }
  func.func @transform_5(%arg0: i32) -> (i32, i32) {
    %c0_i32 = arith.constant 0 : i32
    %c0_i32_0 = arith.constant 0 : i32
    %c0_i32_1 = arith.constant 0 : i32
    return %c0_i32, %c0_i32_0 : i32, i32
  }
  func.func @transform_6(%arg0: i32) -> i32 {
    %c0_i32 = arith.constant 0 : i32
    %c0_i32_0 = arith.constant 0 : i32
    return %c0_i32 : i32
  }
  func.func @transform_7(%arg0: i32) -> (i32, i32, i32) {
    %c0_i32 = arith.constant 0 : i32
    %c0_i32_0 = arith.constant 0 : i32
    %c0_i32_1 = arith.constant 0 : i32
    return %arg0, %c0_i32, %c0_i32_0 : i32, i32, i32
  }
}

</mosaic_0001>

<bundles_post_ra>
// kernel: tpu_custom_call.1
= control target key start
LH: loop header
LB: loop body
LE: loop exit
PB: predicated region body
PF: predicated region fallthrough
CT: control target
= control target key end

     0   :  { %s915_s0 = inlined_call_operand.hbm [shape: f32[2,4,256], index: 0, kind: input, shape index: {}]   ;;  %s916_s1 = inlined_call_operand.vmem [shape: f32[4,2], index: 1, kind: input, shape index: {}]   ;;  %s917_s2 = inlined_call_operand.vmem [shape: f32[1,2], index: 2, kind: input, shape index: {}]   ;;  %s918_s3 = inlined_call_operand.vmem [shape: f32[4,2], index: 3, kind: input, shape index: {}]   ;;  %s919_s4 = inlined_call_operand.vmem [shape: f32[4,1], index: 4, kind: input, shape index: {}]   ;;  %s920_s5 = inlined_call_operand.vmem [shape: f32[4,1], index: 5, kind: input, shape index: {}]   ;;  %s921_s6 = inlined_call_operand.<no memory space> [shape: f32[1], index: 6, kind: input, shape index: {}]   ;;  %s922_s7 = inlined_call_operand.hbm [shape: f32[2,4,256], index: 7, kind: output, shape index: {}]  }
   0x1   :  { %12 = sst [smem:[#allocation2]] %s921_s6 }
   0x2   :  { %13 = vsyncpa [#allocation4], 0 }
   0x3   :  { %15 = vsyncpa [#allocation4 + $0x1], 0 }
   0x4   :  { %16 = vsyncpa [#allocation5], 0 }
   0x5   :  { %18 = vsyncpa [#allocation5 + $0x1], 0  ;;  %s752_s26 = smov 0   ;;  %s754_s27 = smov 0  }
   0x6   :  { %s756_s28 = smov 0   ;;  %s758_s29 = smov 0  }
   0x7 LB: > { %s773_s6 = sadd.s32 4294967295, %s705_s29   ;;  %s528_s30 = sadd.s32 4294967294, %s705_s29   ;;  %s705_s29 = sphi %s758_s29, %s934_s29   ;;  %s701_s28 = sphi %s756_s28, %s933_s28   ;;  %s697_s27 = sphi %s754_s27, %s932_s27   ;;  %s693_s26 = sphi %s752_s26, %s931_s26  }
   0x8   : > { %s777_s8 = sadd.s32 1, %s705_s29   ;;  %s31_s9 = sadd.s32 1, %s701_s28 }
   0x9   : > { %s28_s10 = ssub.s32 %s705_s29, %s777_s8  ;;  %p38_p0 = scmp.ne.s32.totalorder %s701_s28, %s697_s27 }
   0xa   : > { %p29_p1 = scmp.eq.s32.totalorder %s28_s10, 0  ;;  %p39_p2 = scmp.eq.s32.totalorder %s705_s29, 0 }
   0xb   : > { %p44_p3 = scmp.ne.s32.totalorder %s697_s27, %s693_s26  ;;  %p45_p4 = scmp.eq.s32.totalorder %s773_s6, 0 }
   0xc   : > { %s789_s11 = scalar_select %p29_p1, %s701_s28, %s31_s9  }
   0xd   : > { %p791_p5 = por %p39_p2, %p38_p0  ;;  %p795_p6 = por %p45_p4, %p44_p3 }
   0xe   : > { %p194_p7 = scmp.eq.s32.totalorder %s773_s6, 1  ;;  %p200_p8 = scmp.eq.s32.totalorder %s528_s30, 1 }
   0xf   : > { %p559_p10 = scmp.lt.s32.totalorder %s705_s29, 2  ;;  %s238_s16 = sand.u32 1, %s701_s28  }
  0x10   : > { %p802_p11 = por %p194_p7, %p38_p0  ;;  %p806_p12 = por %p200_p8, %p44_p3 }
  0x11   : > { %s545_s17 = sshll.u32 %s705_s29, 3  ;;  %s531_s18 = sshll.u32 %s238_s16, 3 }
  0x12   : > { %s247_s21 = scalar_lea.hbm %s915_s0, %s545_s17  ;;  %s242_s23 = scalar_lea.vmem [#allocation3], %s531_s18 }
  0x13   : > { %s249_s22 = sshll.u32 %s247_s21, 4  ;;  %s251_s24 = sshll.u32 %s242_s23, 4  ;;  %s250_s22 = int_to_ptr.hbm [resolvable:$true] %s249_s22  ;;  %s252_s24 = int_to_ptr.vmem [resolvable:$true] %s251_s24 }
  0x14   : > { %p817_p13 = pnand %p559_p10, %p791_p5  ;;  %p534_p0 = scmp.ge.s32.totalorder %s705_s29, 1 }
  0x15   : > { %p256_p1 = scmp.lt.s32.totalorder %s705_s29, 3  ;;  %s239_s30 = scalar_lea.sflag [#allocation4], %s238_s16 }
  0x16   : > { %s609_s9 = sshra.s32 %s250_s22, 4  ;;  %p613_p3 = pneg %p817_p13  ;;  %s610_s9 = int_to_ptr.hbm [resolvable:$true] %s609_s9 }
  0x17   : > { %s611_s10 = scalar_lea.hbm %s610_s9, 8  ;;  %s616_s12 = scalar_lea.hbm %s915_s0, 16 }
  0x18   : > { %p612_p2 = scmp.ne.s32.totalorder %s610_s9, %s611_s10  ;;  %p617_p5 = scmp.lt.s32.totalorder %s610_s9, %s915_s0 }
  0x19   : > { %p618_p8 = scmp.lt.s32.totalorder %s616_s12, %s611_s10 }
  0x1a   : > { %p614_p4 = pnand %p613_p3, %p612_p2 }
  0x1b   : > { %p619_p10 = por %p618_p8, %p617_p5 }
  0x1c   : > { %p615_p7 = pneg %p614_p4 }
  0x1e   : > { %p620_p9 = pnand %p619_p10, %p615_p7 }
  0x20   : > { %623 = shalt.err (!%p620_p9)
}
  0x21   : > { %554 = dma.hbm_to_vmem [thread:$0]  (!%p817_p13), %s250_s22, 128, %s252_s24, %s239_s30  }
  0x22   : > { %p257_p2 = pnand %p534_p0, %p256_p1 }
  0x23   : > { %s838_s16 = sand.u32 (!%p257_p2), 1, %s697_s27  }
  0x24   : > { %260 = sbr.rel (%p257_p2) target bundleno = 515 (0x203), region = 48  ;;  %s535_s21 = sshll.u32 (!%p257_p2), %s838_s16, 3 }
  0x25   : > { %s263_s23 = scalar_lea.sflag (!%p257_p2), [#allocation4], %s838_s16  ;;  %s266_s9 = scalar_lea.vmem (!%p257_p2), [#allocation3], %s535_s21 }
  0x29   : > { %684 = dma.done.wait (%p795_p6), %s263_s23, 128  }
  0x2a   : > { %686 = vsyncadd (%p795_p6), %s263_s23, 4294967168  ;;  %v848_v0 = vld [vmem:[%s266_s9] sm:$0xff]  ;;  %vm305_vm0 = vcmask 1043456   ;;  %v313_v6 = vld [vmem:[%s916_s1] sm:$0xf]  ;;  %vm315_vm1 = vcmask 11264  }
  0x2b   : > { %300 = vst [vmem:[#allocation1] ss:$2 sm:$0xff] %v848_v0  ;;  %v323_v16 = vld [vmem:[%s917_s2] sm:$0x1]  ;;  %v707_v24 = vmov 0   ;;  %s355_s20 = sld [smem:[#allocation2]] }
  0x2c   : > { %v326_v20 = vld [vmem:[%s918_s3] sm:$0xf]  ;;  %595 = vset.pattern.permute.xlu1 %v707_v24  ;;  %596 = vset.pattern.permute.xlu0 %v707_v24  ;;  %s546_s23 = sshll.u32 %s773_s6, 3  ;;  %s297_s6 = scalar_lea.vmem [#allocation6], %s535_s21 }
  0x2d   : > { %v332_v25 = vld [vmem:[%s919_s4] sm:$0xf]  ;;  %s453_s24 = scalar_lea.hbm %s922_s7, %s546_s23  ;;  %s455_s13 = sshll.u32 %s297_s6, 4  ;;  %s456_s13 = int_to_ptr.vmem [resolvable:$true] %s455_s13 }
  0x2e   : > { %v353_v39 = vld [vmem:[%s920_s5] sm:$0xf]  ;;  %s457_s25 = sshll.u32 %s453_s24, 4  ;;  %s442_s30 = scalar_lea.sflag [#allocation5], %s838_s16  ;;  %s458_s25 = int_to_ptr.hbm [resolvable:$true] %s457_s25 }
  0x2f   : > { %s653_s10 = sshra.s32 %s458_s25, 4  ;;  %s659_s12 = scalar_lea.hbm %s922_s7, 16  ;;  %s654_s10 = int_to_ptr.hbm [resolvable:$true] %s653_s10 }
  0x30   : > { %s655_s17 = scalar_lea.hbm %s654_s10, 8  ;;  %p660_p0 = scmp.lt.s32.totalorder %s654_s10, %s922_s7 }
  0x31   : > { %v382_v60 = vstv %s355_s20  ;;  %p656_p6 = scmp.ne.s32.totalorder %s654_s10, %s655_s17  ;;  %p661_p1 = scmp.lt.s32.totalorder %s659_s12, %s655_s17 }
  0x32   : > { %v301_v1 = vld.sshfl [vmem:[#allocation1] sm:$0xff pattern:$0x75316420]  ;;  %v302_v2 = vld.sshfl [vmem:[#allocation1 + $0x8] sm:$0xff pattern:$0x75316420] }
  0x33   : > { %v306_v3 = vsel %vm305_vm0, %v301_v1, 0.0  ;;  %v307_v4 = vsel %vm305_vm0, %v302_v2, 0.0  ;;  %361 = vst [vmem:[#allocation1] ss:$2 sm:$0xff] %v848_v0  ;;  %p657_p9 = pnand %p656_p6, %p802_p11  ;;  %p662_p3 = por %p661_p1, %p660_p0 }
  0x34   : > { %v308_v5 = vadd.f32 %v307_v4, %v306_v3 }
  0x35   : > { %p658_p13 = pneg %p657_p9 }
  0x36   : > { %309 = vadd.xlane.f32.xlu0 %v308_v5 }
  0x37   : > { %p663_p4 = pnand %p662_p3, %p658_p13 }
  0x3a   : > { %v362_v43 = vld.sshfl [vmem:[#allocation1] sm:$0xff pattern:$0x75316420]  ;;  %v363_v44 = vld.sshfl [vmem:[#allocation1 + $0x8] sm:$0xff pattern:$0x75316420] }
  0xa9   : > { %v310_v7 = vpop.xlane.xlu0 %309 }
  0xaa   : > { %v312_v8 = vmul.f32 0.00390625, %v310_v7 }
  0xac   : > { %v314_v9 = vmul.f32 %v313_v6, %v312_v8 }
  0xae   : > { %v316_v10 = vsel %vm315_vm1, %v314_v9, 0.0 }
  0xaf   : > { %v317_v11 = vrot.slane %v316_v10, 4 }
  0xb1   : > { %v318_v12 = vadd.f32 %v317_v11, %v316_v10 }
  0xb3   : > { %v319_v13 = vrot.slane %v318_v12, 2 }
  0xb5   : > { %v320_v14 = vadd.f32 %v319_v13, %v318_v12  ;;  %v708_v13 = vmov 839922192  }
  0xb7   : > { %v321_v15 = vrot.slane %v320_v14, 1 }
  0xb9   : > { %v322_v17 = vadd.f32 %v321_v15, %v320_v14  ;;  %v428_v14 = vunpack.c.l.s4 %v708_v13 }
  0xbb   : > { %v324_v18 = vadd.f32 %v323_v16, %v322_v17 }
  0xbd   : > { %v325_v19 = vmax.f32 %v324_v18, 0.0 }
  0xbf   : > { %v327_v21 = vperm.slane %v325_v19, 0 }
  0xc1   : > { %v328_v22 = vmul.f32 %v327_v21, %v326_v20 }
  0xc3   : > { %v329_v23 = vsel %vm315_vm1, %v328_v22, 0.0  ;;  %v429_v22 = vunpack.c.0.s8 %v428_v14 }
  0xc4   : > { %330 = vadd.xlane.f32.xlu0 %v329_v23 }
 0x137   : > { %v331_v26 = vpop.xlane.xlu0 %330 }
 0x138   : > { %v333_v27 = vadd.f32 %v332_v25, %v331_v26 }
 0x13a   : > { %v537_v28 = vmul.f32 -1.442695, %v333_v27 }
 0x13c   : > { %597 = vpow2.f32 %v537_v28 }
 0x142   : > { %v598_v29 = vpop.eup %597 }
 0x143   : > { %v337_v30 = vadd.f32 1.0, %v598_v29 }
 0x145   : > { %599 = vrcp.f32 %v337_v30  ;;  %v349_v34 = vand.u32 2147483648, %v337_v30  ;;  %v347_v36 = vand.u32 2147483647, %v337_v30  ;;  %vm343_vm3 = vweird.f32 %v337_v30 }
 0x147   : > { %v350_v38 = vor.u32 1.1754944e-38, %v349_v34  ;;  %vm348_vm5 = vcmp.eq.f32.partialorder %v347_v36, 8.507059e+37 }
 0x14b   : > { %v600_v31 = vpop.eup %599 }
 0x14c   : > { %v339_v32 = vmul.f32 %v600_v31, %v337_v30  ;;  %vm344_vm2 = vweird.f32 %v600_v31 }
 0x14d   : > { %vm345_vm4 = vmor %vm343_vm3, %vm344_vm2 }
 0x14e   : > { %v340_v33 = vsub.f32 1.0, %v339_v32 }
 0x150   : > { %v341_v35 = vmul.f32 %v600_v31, %v340_v33 }
 0x152   : > { %v342_v37 = vadd.f32 %v600_v31, %v341_v35 }
 0x154   : > { %v346_v40 = vsel %vm345_vm4, %v600_v31, %v342_v37 }
 0x155   : > { %v351_v41 = vsel %vm348_vm5, %v350_v38, %v346_v40 }
 0x156   : > { %v354_v42 = vmul.f32 %v353_v39, %v351_v41 }
 0x158   : > { %358 = vperm.xlu1 %595, %v354_v42  }
 0x160   : > { %425 = vperm.xlu1 %595, %v351_v41  }
 0x1ca   : > { %v359_v45 = vpop.permute.xlu1 %358 }
 0x1cb   : > { %v366_v46 = vmul.f32 %v362_v43, %v359_v45  ;;  %v367_v47 = vmul.f32 %v363_v44, %v359_v45 }
 0x1cd   : > { %v368_v48 = vsel %vm305_vm0, %v366_v46, 0.0  ;;  %v375_v49 = vsel %vm305_vm0, %v367_v47, 0.0 }
 0x1ce   : > { %v369_v50 = vrot.slane %v368_v48, 4  ;;  %v376_v51 = vrot.slane %v375_v49, 4 }
 0x1d0   : > { %v370_v52 = vadd.f32 %v369_v50, %v368_v48  ;;  %v377_v53 = vadd.f32 %v376_v51, %v375_v49 }
 0x1d2   : > { %v371_v54 = vrot.slane %v370_v52, 2  ;;  %v378_v55 = vrot.slane %v377_v53, 2  ;;  %v426_v26 = vpop.permute.xlu1 %425 }
 0x1d3   : > { %v430_v32 = vperm.slane %v426_v26, %v429_v22 }
 0x1d4   : > { %v372_v56 = vadd.f32 %v371_v54, %v370_v52  ;;  %v379_v57 = vadd.f32 %v378_v55, %v377_v53 }
 0x1d5   : > { %v432_v37 = vmul.f32 %v430_v32, %v848_v0 }
 0x1d6   : > { %v373_v58 = vrot.slane %v372_v56, 1  ;;  %v380_v59 = vrot.slane %v379_v57, 1 }
 0x1d8   : > { %v374_v61 = vadd.f32 %v373_v58, %v372_v56  ;;  %v381_v62 = vadd.f32 %v380_v59, %v379_v57 }
 0x1da   : > { %v383_v63 = vadd.f32 %v382_v60, %v374_v61  ;;  %v384_v1 = vadd.f32 %v382_v60, %v381_v62 }
 0x1dc   : > { %v538_v2 = vmul.f32 -1.442695, %v383_v63  ;;  %v539_v3 = vmul.f32 -1.442695, %v384_v1 }
 0x1de   : > { %601 = vpow2.f32 %v538_v2 }
 0x1df   : > { %603 = vpow2.f32 %v539_v3 }
 0x1e4   : > { %v602_v4 = vpop.eup %601 }
 0x1e5   : > { %v604_v5 = vpop.eup %603  ;;  %v391_v6 = vadd.f32 1.0, %v602_v4 }
 0x1e6   : > { %v392_v7 = vadd.f32 1.0, %v604_v5 }
 0x1e7   : > { %605 = vrcp.f32 %v391_v6  ;;  %vm398_vm8 = vweird.f32 %v391_v6  ;;  %v404_v21 = vand.u32 2147483648, %v391_v6  ;;  %v402_v24 = vand.u32 2147483647, %v391_v6 }
 0x1e8   : > { %607 = vrcp.f32 %v392_v7  ;;  %v419_v17 = vand.u32 2147483648, %v392_v7  ;;  %v417_v19 = vand.u32 2147483647, %v392_v7  ;;  %vm413_vm10 = vweird.f32 %v392_v7 }
 0x1e9   : > { %v405_v30 = vor.u32 1.1754944e-38, %v404_v21  ;;  %vm403_vm13 = vcmp.eq.f32.partialorder %v402_v24, 8.507059e+37 }
 0x1ea   : > { %v420_v27 = vor.u32 1.1754944e-38, %v419_v17  ;;  %vm418_vm12 = vcmp.eq.f32.partialorder %v417_v19, 8.507059e+37 }
 0x1ed   : > { %v606_v8 = vpop.eup %605 }
 0x1ee   : > { %v608_v9 = vpop.eup %607  ;;  %v394_v10 = vmul.f32 %v606_v8, %v391_v6  ;;  %vm399_vm6 = vweird.f32 %v606_v8 }
 0x1ef   : > { %v409_v11 = vmul.f32 %v608_v9, %v392_v7  ;;  %vm414_vm7 = vweird.f32 %v608_v9  ;;  %vm871_vm9 = vmor %vm398_vm8, %vm399_vm6 }
 0x1f0   : > { %v395_v12 = vsub.f32 1.0, %v394_v10  ;;  %vm415_vm11 = vmor %vm413_vm10, %vm414_vm7 }
 0x1f1   : > { %v410_v15 = vsub.f32 1.0, %v409_v11 }
 0x1f2   : > { %v396_v16 = vmul.f32 %v606_v8, %v395_v12 }
 0x1f3   : > { %v411_v18 = vmul.f32 %v608_v9, %v410_v15 }
 0x1f4   : > { %v397_v20 = vadd.f32 %v606_v8, %v396_v16 }
 0x1f5   : > { %v412_v25 = vadd.f32 %v608_v9, %v411_v18 }
 0x1f6   : > { %v401_v28 = vsel %vm871_vm9, %v606_v8, %v397_v20 }
 0x1f7   : > { %v416_v29 = vsel %vm415_vm11, %v608_v9, %v412_v25  ;;  %v406_v34 = vsel %vm403_vm13, %v405_v30, %v401_v28 }
 0x1f8   : > { %v421_v31 = vsel %vm418_vm12, %v420_v27, %v416_v29 }
 0x1f9   : > { %v435_v33 = vrot.slane %v421_v31, 4 }
 0x1fb   : > { %v436_v35 = vsel %vm305_vm0, %v406_v34, %v435_v33 }
 0x1fc   : > { %v438_v36 = vmul.f32 %v436_v35, %v848_v0 }
 0x1fe   : > { %v439_v38 = vmax.f32 %v432_v37, %v438_v36 }
 0x200   : > { %440 = vst [vmem:[%s297_s6] sm:$0xff] %v439_v38 }
 0x201   : > { %666 = shalt.err (!%p663_p4)
}
 0x202   : > { %549 = dma.vmem_to_hbm [thread:$0]  (%p802_p11), %s456_s13, 128, %s458_s25, %s442_s30  }
 0x203 PF: > { %s469_s16 = sand.u32 1, %s693_s26   ;;  %p930_p7 = scmp.ge.s32.totalorder %s705_s29, 2 }
 0x204   : > { %s470_s23 = scalar_lea.sflag [#allocation5], %s469_s16 }
 0x205   : > { %p556_p5 = pnand %p930_p7, %p806_p12 }
 0x207   : > { %p557_p8 = pneg %p556_p5 }
 0x209   : > { %688 = dma.done.wait (%p557_p8), %s470_s23, 128  }
 0x20a   : > { %690 = vsyncadd (%p557_p8), %s470_s23, 4294967168  ;;  %p21_p10 = scmp.ge.s32.totalorder %s777_s8, 4   ;;  %s931_s26 = smov %s697_s27 }
 0x20b   : > { %s932_s27 = smov %s701_s28  ;;  %s933_s28 = smov %s789_s11 }
 0x20c   : > { %s934_s29 = smov %s777_s8  ;;  %23 = sbr.rel (!%p21_p10) target bundleno = 7 (0x7), region = 93 }
 0x211   :  { %476 = vsyncpa [#allocation4], 1 }
 0x212   :  { %478 = vsyncpa [#allocation4 + $0x1], 1 }
 0x213   :  { %479 = vsyncpa [#allocation5], 1 }
 0x214   :  { %481 = vsyncpa [#allocation5 + $0x1], 1 }

</bundles_post_ra>
